<compile_context>
chip_gen: v5e
topology: v5e:2x2
jax: 0.10.0
libtpu: 0.0.40
codegen_flags: <defaults>
</compile_context>

<pallas_src>
import functools

import jax
import jax.numpy as jnp
from jax.experimental import pallas as pl
from jax.experimental.pallas import tpu as pltpu


def _round_up(v, m):
    return ((v + m - 1) // m) * m


def _vmem_limit_cap():
    """~75% of physical VMEM (headroom for Mosaic scratch), capped at 100 MiB."""
    cap_bytes = 64 * 1024 * 1024  # conservative default (v7x per-TensorCore VMEM)
    try:
        cap_bytes = int(pltpu.get_tpu_info().vmem_capacity_bytes)
    except Exception:
        pass
    return int(min(cap_bytes * 3 // 4, 100 * 1024 * 1024))


def _mlp_kernel(th, x_ref, wgu_ref, bgu_ref, wd_ref, o_ref, acc_ref):
    # x_ref:   (tm, Dp)    bf16 input row tile
    # wgu_ref: (Dp, 2*th)  bf16 [gate chunk | up chunk] fused weight slab
    # bgu_ref: (1, 2*th)   f32  [gate bias chunk | up bias chunk]
    # wd_ref:  (th, Dp)    bf16 down_proj weight chunk (rows = this H chunk)
    # o_ref:   (tm, Dp)         output tile (written on last H chunk)
    # acc_ref: (tm, Dp)    f32  accumulator scratch, persists across the H axis
    k = pl.program_id(1)

    @pl.when(k == 0)
    def _():
        acc_ref[...] = jnp.zeros_like(acc_ref)

    # One fused MXU matmul for gate and up projections; f32 accumulation.
    gu = jnp.dot(x_ref[...], wgu_ref[...], preferred_element_type=jnp.float32)
    gu = gu + bgu_ref[...]                     # f32 bias add
    gate = gu[:, :th]                          # lane-aligned split (th % 128 == 0)
    up = gu[:, th:]
    # Matches the PyTorch module: gate_proj(x) * SiLU(up_proj(x)).
    h = gate * (up * jax.nn.sigmoid(up))       # f32 elementwise

    acc_ref[...] += jnp.dot(h.astype(wd_ref.dtype), wd_ref[...],
                            preferred_element_type=jnp.float32)

    @pl.when(k == pl.num_programs(1) - 1)
    def _():
        o_ref[...] = acc_ref[...].astype(o_ref.dtype)


def pack_skyer_mlp_weights(wg, bg, wu, bu, wd, *, th=512,
                           compute_dtype=jnp.bfloat16):
    """One-time repack of SkyerMLP parameters (PyTorch (out, in) layout).

    wg/wu: [H, D], bg/bu: [H], wd: [D, H]. Call once at parameter-load time and
    reuse the result for every forward (avoids per-call transpose/pad HBM traffic).
    """
    H, D = wg.shape
    Dp = _round_up(D, 128)
    th_eff = min(th, _round_up(H, 128))        # hidden chunk, multiple of 128
    Hp = _round_up(H, th_eff)
    nh = Hp // th_eff

    wg_p = jnp.zeros((Dp, Hp), compute_dtype).at[:D, :H].set(wg.T.astype(compute_dtype))
    wu_p = jnp.zeros((Dp, Hp), compute_dtype).at[:D, :H].set(wu.T.astype(compute_dtype))
    # Interleave per H-chunk: block k (width 2*th) = [gate chunk k | up chunk k].
    wgu = jnp.concatenate(
        [wg_p.reshape(Dp, nh, th_eff), wu_p.reshape(Dp, nh, th_eff)], axis=2
    ).reshape(Dp, nh * 2 * th_eff)

    bg_p = jnp.zeros((Hp,), jnp.float32).at[:H].set(bg.astype(jnp.float32))
    bu_p = jnp.zeros((Hp,), jnp.float32).at[:H].set(bu.astype(jnp.float32))
    bgu = jnp.concatenate(
        [bg_p.reshape(nh, th_eff), bu_p.reshape(nh, th_eff)], axis=1
    ).reshape(1, nh * 2 * th_eff)

    wd_p = jnp.zeros((Hp, Dp), compute_dtype).at[:H, :D].set(wd.T.astype(compute_dtype))

    return dict(wgu=wgu, bgu=bgu, wd=wd_p, D=D, H=H, Dp=Dp, Hp=Hp,
                th=th_eff, nh=nh, compute_dtype=compute_dtype)


def skyer_mlp_pallas_packed(x, packed, *, tm=512):
    """x: [B, S, D]; packed: output of pack_skyer_mlp_weights."""
    B, S, D = x.shape
    assert D == packed["D"], "input feature dim mismatch vs packed weights"
    Dp, Hp, th, nh = packed["Dp"], packed["Hp"], packed["th"], packed["nh"]
    wgu, bgu, wd_p = packed["wgu"], packed["bgu"], packed["wd"]
    compute_dtype = packed["compute_dtype"]

    M = B * S
    out_dtype = x.dtype
    w_item = jnp.dtype(compute_dtype).itemsize
    out_item = jnp.dtype(out_dtype).itemsize

    # Row tile: multiple of 16 (bf16 sublane pack; also satisfies f32's 8).
    tm_eff = min(tm, _round_up(M, 16))
    # Prefer >=2 M tiles so the parallel axis can shard across v7x's 2 TensorCores.
    if M >= 256 and _round_up(M, tm_eff) // tm_eff < 2:
        tm_eff = _round_up((M + 1) // 2, 16)
    Mp = _round_up(M, tm_eff)
    n_m = Mp // tm_eff

    x2 = jnp.zeros((Mp, Dp), compute_dtype).at[:M, :D].set(
        x.reshape(M, D).astype(compute_dtype))

    # VMEM working set (double-buffered pipeline buffers + scratch/intermediates).
    vmem_need = (
        2 * tm_eff * Dp * w_item          # x tile
        + 2 * Dp * 2 * th * w_item        # fused gate/up weight slab
        + 2 * 2 * th * 4                  # fused f32 bias
        + 2 * th * Dp * w_item            # down-proj weight chunk
        + 2 * tm_eff * Dp * out_item      # output tile
        + tm_eff * Dp * 4                 # f32 accumulator scratch
        + tm_eff * 2 * th * 4             # gu / h f32 intermediates
    )
    vmem_limit = int(min(_vmem_limit_cap(),
                         max(32 * 1024 * 1024, int(1.3 * vmem_need))))

    cost = pl.CostEstimate(
        flops=6 * Mp * Dp * Hp,
        transcendentals=Mp * Hp,
        bytes_accessed=(
            x2.size * w_item + Mp * Dp * out_item
            # Weights are re-streamed from HBM once per M tile.
            + n_m * (wgu.size * w_item + wd_p.size * w_item + bgu.size * 4)),
    )

    kernel = functools.partial(_mlp_kernel, th)

    out = pl.pallas_call(
        kernel,
        out_shape=jax.ShapeDtypeStruct((Mp, Dp), out_dtype),
        grid_spec=pltpu.PrefetchScalarGridSpec(
            num_scalar_prefetch=0,
            grid=(n_m, nh),
            in_specs=[
                pl.BlockSpec((tm_eff, Dp), lambda i, k: (i, 0)),     # x tile
                pl.BlockSpec((Dp, 2 * th), lambda i, k: (0, k)),     # fused gate/up W
                pl.BlockSpec((1, 2 * th), lambda i, k: (0, k)),      # fused bias
                pl.BlockSpec((th, Dp), lambda i, k: (k, 0)),         # down-proj W
            ],
            out_specs=pl.BlockSpec((tm_eff, Dp), lambda i, k: (i, 0)),
            scratch_shapes=[pltpu.VMEM((tm_eff, Dp), jnp.float32)],
        ),
        compiler_params=pltpu.CompilerParams(
            dimension_semantics=("parallel", "arbitrary"),
            vmem_limit_bytes=vmem_limit,
        ),
        cost_estimate=cost,
    )(x2, wgu, bgu, wd_p)

    return out[:M, :D].reshape(B, S, D)


def skyer_mlp_pallas(x, wg, bg, wu, bu, wd, *, tm=512, th=512,
                     compute_dtype=jnp.bfloat16):
    """Convenience entry: packs weights then runs. For repeated forwards, call
    pack_skyer_mlp_weights once and use skyer_mlp_pallas_packed directly."""
    packed = pack_skyer_mlp_weights(wg, bg, wu, bu, wd, th=th,
                                    compute_dtype=compute_dtype)
    return skyer_mlp_pallas_packed(x, packed, tm=tm)


def skyer_mlp_ref(x, wg, bg, wu, bu, wd):
    gate = jnp.einsum("bsd,hd->bsh", x, wg) + bg
    up = jnp.einsum("bsd,hd->bsh", x, wu) + bu
    h = gate * (up * jax.nn.sigmoid(up))
    return jnp.einsum("bsh,dh->bsd", h, wd)


if __name__ == "__main__":
    B, S, D, H = 2, 8, 32, 64  # batch, seq, input_dim, hide_dim
    key = jax.random.PRNGKey(0)
    kx, kg, kbg, ku, kbu, kd = jax.random.split(key, 6)

    x = jax.random.normal(kx, (B, S, D), dtype=jnp.float32)
    # PyTorch Linear weight layout: (out_features, in_features).
    wg = jax.random.normal(kg, (H, D), dtype=jnp.float32) * 0.05
    bg = jax.random.normal(kbg, (H,), dtype=jnp.float32) * 0.05
    wu = jax.random.normal(ku, (H, D), dtype=jnp.float32) * 0.05
    bu = jax.random.normal(kbu, (H,), dtype=jnp.float32) * 0.05
    wd = jax.random.normal(kd, (D, H), dtype=jnp.float32) * 0.05

    packed = pack_skyer_mlp_weights(wg, bg, wu, bu, wd)   # one-time repack
    out = skyer_mlp_pallas_packed(x, packed)
    out = jax.block_until_ready(out)

    ref = skyer_mlp_ref(x, wg, bg, wu, bu, wd)
    assert out.shape == (B, S, D)
    # bf16 MXU operands with f32 accumulation: relaxed tolerance vs f32 reference.
    assert jnp.allclose(out, ref, atol=5e-3, rtol=5e-2), "mismatch vs reference"

    print("KERNEL_OK")
</pallas_src>

<mosaic_0001>
module attributes {stable_mosaic.version = 11 : i64} {
  func.func @_mlp_kernel(%arg0: i32, %arg1: i32, %arg2: memref<16x128xbf16, #tpu.memory_space<vmem>>, %arg3: memref<128x256xbf16, #tpu.memory_space<vmem>>, %arg4: memref<1x256xf32, #tpu.memory_space<vmem>>, %arg5: memref<128x128xbf16, #tpu.memory_space<vmem>>, %arg6: memref<16x128xf32, #tpu.memory_space<vmem>>, %arg7: memref<16x128xf32, #tpu.memory_space<vmem>>) attributes {dimension_semantics = [#tpu.dimension_semantics<parallel>, #tpu.dimension_semantics<arbitrary>], iteration_bounds = array<i64: 1, 1>, scalar_prefetch = 0 : i64, scratch_operands = 1 : i64, tpu.core_type = #tpu.core_type<tc>, window_params = [{transform_indices = @transform_0, window_bounds = array<i64: 16, 128>}, {transform_indices = @transform_1, window_bounds = array<i64: 128, 256>}, {transform_indices = @transform_2, window_bounds = array<i64: 1, 256>}, {transform_indices = @transform_3, window_bounds = array<i64: 128, 128>}, {transform_indices = @transform_4, window_bounds = array<i64: 16, 128>}]} {
    %c0_i32 = arith.constant 0 : i32
    %0 = arith.cmpi eq, %arg1, %c0_i32 : i32
    %1 = arith.extui %0 : i1 to i32
    %c0_i32_0 = arith.constant 0 : i32
    %2 = arith.cmpi ne, %1, %c0_i32_0 : i32
    scf.if %2 {
      %cst_16 = arith.constant 0.000000e+00 : f32
      %27 = vector.broadcast %cst_16 : f32 to vector<16x128xf32>
      %c0_17 = arith.constant 0 : index
      %c0_18 = arith.constant 0 : index
      %28 = vector.load %arg7[%c0_17, %c0_18] : memref<16x128xf32, #tpu.memory_space<vmem>>, vector<16x128xf32>
      tpu.vector_store %arg7[%c0_17, %c0_18], %27 {strides = array<i32>} : memref<16x128xf32, #tpu.memory_space<vmem>>, vector<16x128xf32>,
    } else {
    }
    %c0 = arith.constant 0 : index
    %c0_1 = arith.constant 0 : index
    %3 = vector.load %arg2[%c0, %c0_1] : memref<16x128xbf16, #tpu.memory_space<vmem>>, vector<16x128xbf16>
    %c0_2 = arith.constant 0 : index
    %c0_3 = arith.constant 0 : index
    %4 = vector.load %arg3[%c0_2, %c0_3] : memref<128x256xbf16, #tpu.memory_space<vmem>>, vector<128x256xbf16>
    %cst = arith.constant dense<0.000000e+00> : vector<16x256xf32>
    %5 = tpu.matmul %3, %4, %cst {dimension_numbers = #tpu.dot_dimension_numbers<[1], [0], [0], [1], [0, 0, 1, 1], [], []>} : vector<16x128xbf16>, vector<128x256xbf16>, vector<16x256xf32> -> vector<16x256xf32>
    %c0_4 = arith.constant 0 : index
    %c0_5 = arith.constant 0 : index
    %6 = vector.load %arg4[%c0_4, %c0_5] : memref<1x256xf32, #tpu.memory_space<vmem>>, vector<1x256xf32>
    %7 = vector.broadcast %6 : vector<1x256xf32> to vector<16x256xf32>
    %8 = arith.addf %5, %7 : vector<16x256xf32>
    %9 = vector.extract_strided_slice %8 {offsets = [0, 0], sizes = [16, 128], strides = [1, 1]} : vector<16x256xf32> to vector<16x128xf32>
    %10 = vector.extract_strided_slice %8 {offsets = [0, 128], sizes = [16, 128], strides = [1, 1]} : vector<16x256xf32> to vector<16x128xf32>
    %11 = arith.negf %10 : vector<16x128xf32>
    %12 = math.exp %11 : vector<16x128xf32>
    %cst_6 = arith.constant 1.000000e+00 : f32
    %13 = vector.broadcast %cst_6 : f32 to vector<16x128xf32>
    %14 = arith.addf %13, %12 : vector<16x128xf32>
    %15 = arith.divf %13, %14 : vector<16x128xf32>
    %16 = arith.mulf %10, %15 : vector<16x128xf32>
    %17 = arith.mulf %9, %16 : vector<16x128xf32>
    %c0_7 = arith.constant 0 : index
    %c0_8 = arith.constant 0 : index
    %18 = vector.load %arg7[%c0_7, %c0_8] : memref<16x128xf32, #tpu.memory_space<vmem>>, vector<16x128xf32>
    %19 = arith.truncf %17 : vector<16x128xf32> to vector<16x128xbf16>
    %c0_9 = arith.constant 0 : index
    %c0_10 = arith.constant 0 : index
    %20 = vector.load %arg5[%c0_9, %c0_10] : memref<128x128xbf16, #tpu.memory_space<vmem>>, vector<128x128xbf16>
    %cst_11 = arith.constant dense<0.000000e+00> : vector<16x128xf32>
    %21 = tpu.matmul %19, %20, %cst_11 {dimension_numbers = #tpu.dot_dimension_numbers<[1], [0], [0], [1], [0, 0, 1, 1], [], []>} : vector<16x128xbf16>, vector<128x128xbf16>, vector<16x128xf32> -> vector<16x128xf32>
    %22 = arith.addf %18, %21 : vector<16x128xf32>
    %c0_12 = arith.constant 0 : index
    %c0_13 = arith.constant 0 : index
    %23 = vector.load %arg7[%c0_12, %c0_13] : memref<16x128xf32, #tpu.memory_space<vmem>>, vector<16x128xf32>
    tpu.vector_store %arg7[%c0_12, %c0_13], %22 {strides = array<i32>} : memref<16x128xf32, #tpu.memory_space<vmem>>, vector<16x128xf32>,
    %c0_i32_14 = arith.constant 0 : i32
    %24 = arith.cmpi eq, %arg1, %c0_i32_14 : i32
    %25 = arith.extui %24 : i1 to i32
    %c0_i32_15 = arith.constant 0 : i32
    %26 = arith.cmpi ne, %25, %c0_i32_15 : i32
    scf.if %26 {
      %c0_16 = arith.constant 0 : index
      %c0_17 = arith.constant 0 : index
      %27 = vector.load %arg7[%c0_16, %c0_17] : memref<16x128xf32, #tpu.memory_space<vmem>>, vector<16x128xf32>
      %c0_18 = arith.constant 0 : index
      %c0_19 = arith.constant 0 : index
      %28 = vector.load %arg6[%c0_18, %c0_19] : memref<16x128xf32, #tpu.memory_space<vmem>>, vector<16x128xf32>
      tpu.vector_store %arg6[%c0_18, %c0_19], %27 {strides = array<i32>} : memref<16x128xf32, #tpu.memory_space<vmem>>, vector<16x128xf32>,
    } else {
    }
    return
  }
  func.func @transform_0(%arg0: i32, %arg1: i32) -> (i32, i32) {
    %c0_i32 = arith.constant 0 : i32
    %c0_i32_0 = arith.constant 0 : i32
    return %arg0, %c0_i32 : i32, i32
  }
  func.func @transform_1(%arg0: i32, %arg1: i32) -> (i32, i32) {
    %c0_i32 = arith.constant 0 : i32
    %c0_i32_0 = arith.constant 0 : i32
    return %c0_i32, %arg1 : i32, i32
  }
  func.func @transform_2(%arg0: i32, %arg1: i32) -> (i32, i32) {
    %c0_i32 = arith.constant 0 : i32
    %c0_i32_0 = arith.constant 0 : i32
    return %c0_i32, %arg1 : i32, i32
  }
  func.func @transform_3(%arg0: i32, %arg1: i32) -> (i32, i32) {
    %c0_i32 = arith.constant 0 : i32
    %c0_i32_0 = arith.constant 0 : i32
    return %arg1, %c0_i32 : i32, i32
  }
  func.func @transform_4(%arg0: i32, %arg1: i32) -> (i32, i32) {
    %c0_i32 = arith.constant 0 : i32
    %c0_i32_0 = arith.constant 0 : i32
    return %arg0, %c0_i32 : i32, i32
  }
}

</mosaic_0001>

<bundles_post_ra>
// kernel: tpu_custom_call.1
= control target key start
LH: loop header
LB: loop body
LE: loop exit
PB: predicated region body
PF: predicated region fallthrough
CT: control target
= control target key end

     0   :  { %9 = vsyncpa [#allocation4], 0  ;;  %s705_s0 = inlined_call_operand.hbm [shape: bf16[16,128], index: 0, kind: input, shape index: {}]   ;;  %s706_s1 = inlined_call_operand.hbm [shape: bf16[128,256], index: 1, kind: input, shape index: {}]   ;;  %s707_s2 = inlined_call_operand.hbm [shape: f32[1,256], index: 2, kind: input, shape index: {}]   ;;  %s708_s3 = inlined_call_operand.hbm [shape: bf16[128,128], index: 3, kind: input, shape index: {}]   ;;  %s709_s4 = inlined_call_operand.hbm [shape: f32[16,128], index: 4, kind: output, shape index: {}]  }
   0x1   :  { %10 = vsyncpa [#allocation7], 0 }
   0x2   :  { %11 = vsyncpa [#allocation10], 0  ;;  %s30_s17 = sshll.u32 %s706_s1, 4  ;;  %s31_s17 = int_to_ptr.hbm [resolvable:$true] %s30_s17 }
   0x3   :  { %12 = vsyncpa [#allocation5], 0  ;;  %s650_s18 = smov [#allocation6]   ;;  %s17_s22 = sshll.u32 %s705_s0, 4  ;;  %s18_s22 = int_to_ptr.hbm [resolvable:$true] %s17_s22 }
   0x4   :  { %s32_s19 = sshll.u32 %s650_s18, 4  ;;  %s651_s23 = smov 128   ;;  %s33_s19 = int_to_ptr.vmem [resolvable:$true] %s32_s19 }
   0x5   :  { %s652_s24 = smov 8   ;;  %s653_s25 = smov [#allocation3]  }
   0x6   :  { %38 = dma.hbm_to_vmem [thread:$0]  %s31_s17, 2048, %s33_s19, [#allocation7], %s651_s23, %s651_s23, %s652_s24  }
   0x7   :  { %s19_s26 = sshll.u32 %s653_s25, 4  ;;  %s654_s1 = smov 64   ;;  %s20_s26 = int_to_ptr.vmem [resolvable:$true] %s19_s26 }
   0x8   :  { %s655_s27 = smov 4   ;;  %s44_s30 = sshll.u32 %s707_s2, 4  ;;  %s45_s30 = int_to_ptr.hbm [resolvable:$true] %s44_s30 }
   0x9   :  { %25 = dma.hbm_to_vmem [thread:$0]  %s18_s22, 128, %s20_s26, [#allocation4], %s654_s1, %s654_s1, %s655_s27  }
   0xa   :  { %s656_s5 = smov [#allocation8]   ;;  %s54_s8 = sshll.u32 %s708_s3, 4  ;;  %s55_s8 = int_to_ptr.hbm [resolvable:$true] %s54_s8 }
   0xb   :  { %s46_s0 = sshll.u32 %s656_s5, 4  ;;  %s657_s9 = smov [#allocation9]   ;;  %s47_s0 = int_to_ptr.vmem [resolvable:$true] %s46_s0 }
   0xc   :  { %49 = dma.hbm_to_vmem [thread:$0]  %s45_s30, 32, %s47_s0, [#allocation7]  }
   0xd   :  { %s56_s10 = sshll.u32 %s657_s9, 4  ;;  %s57_s10 = int_to_ptr.vmem [resolvable:$true] %s56_s10 }
   0xe   :  { %62 = dma.hbm_to_vmem [thread:$0]  %s55_s8, 1024, %s57_s10, [#allocation10], %s654_s1, %s654_s1, %s655_s27  }
   0xf   :  { %642 = dma.done.wait [#allocation4], 128  }
  0x10   :  { %643 = vsyncadd [#allocation4], 4294967168 }
  0x11   :  { %644 = dma.done.wait [#allocation7], 2080  }
  0x12   :  { %645 = vsyncadd [#allocation7], 4294965216 }
  0x13   :  { %646 = dma.done.wait [#allocation10], 1024  }
  0x14   :  { %647 = vsyncadd [#allocation10], 4294966272  ;;  %v495_v0 = vld [vmem:[#allocation6 + $0x74] sm:$0xf]  ;;  %v442_v1 = vld [vmem:[#allocation6 + $0x78] sm:$0xf0] }
  0x15   :  { %v493_v2 = vld [vmem:[#allocation6 + $0x64] sm:$0xf]  ;;  %v445_v3 = vor.u32 %v495_v0, %v442_v1  ;;  %v434_v4 = vld [vmem:[#allocation6 + $0x68] sm:$0xf0]  ;;  %v491_v6 = vld [vmem:[#allocation6 + $0x54] sm:$0xf] }
  0x16   :  { %v437_v5 = vor.u32 %v493_v2, %v434_v4  ;;  %v426_v7 = vld [vmem:[#allocation6 + $0x58] sm:$0xf0]  ;;  %v440_v8 = vld [vmem:[#allocation6 + $0x70] sm:$0xf]  ;;  %v496_v9 = vld [vmem:[#allocation6 + $0x74] sm:$0xf0] }
  0x17   :  { %209 = vmatpush.bf16.msra.mxu1 %v445_v3  ;;  %v441_v10 = vor.u32 %v496_v9, %v440_v8  ;;  %v432_v11 = vld [vmem:[#allocation6 + $0x60] sm:$0xf]  ;;  %v494_v12 = vld [vmem:[#allocation6 + $0x64] sm:$0xf0]  ;;  %v429_v13 = vor.u32 %v491_v6, %v426_v7  ;;  %v489_v14 = vld [vmem:[#allocation6 + $0x44] sm:$0xf] }
  0x18   :  { %v433_v15 = vor.u32 %v494_v12, %v432_v11  ;;  %v418_v16 = vld [vmem:[#allocation6 + $0x48] sm:$0xf0]  ;;  %v424_v17 = vld [vmem:[#allocation6 + $0x50] sm:$0xf]  ;;  %v492_v18 = vld [vmem:[#allocation6 + $0x54] sm:$0xf0] }
  0x19   :  { %195 = vmatpush.bf16.msra.mxu0 %v441_v10  ;;  %v421_v19 = vor.u32 %v489_v14, %v418_v16  ;;  %v487_v20 = vld [vmem:[#allocation6 + $0x34] sm:$0xf]  ;;  %v425_v21 = vor.u32 %v492_v18, %v424_v17  ;;  %v410_v22 = vld [vmem:[#allocation6 + $0x38] sm:$0xf0]  ;;  %v416_v23 = vld [vmem:[#allocation6 + $0x40] sm:$0xf] }
  0x1a   :  { %v490_v24 = vld [vmem:[#allocation6 + $0x44] sm:$0xf0]  ;;  %v413_v25 = vor.u32 %v487_v20, %v410_v22  ;;  %v485_v26 = vld [vmem:[#allocation6 + $0x24] sm:$0xf]  ;;  %v402_v28 = vld [vmem:[#allocation6 + $0x28] sm:$0xf0] }
  0x1b   :  { %210 = vmatpush.bf16.msra.mxu1 %v437_v5  ;;  %v417_v27 = vor.u32 %v490_v24, %v416_v23  ;;  %v408_v29 = vld [vmem:[#allocation6 + $0x30] sm:$0xf]  ;;  %v488_v30 = vld [vmem:[#allocation6 + $0x34] sm:$0xf0]  ;;  %v405_v31 = vor.u32 %v485_v26, %v402_v28  ;;  %v483_v32 = vld [vmem:[#allocation6 + $0x14] sm:$0xf] }
  0x1c   :  { %v409_v33 = vor.u32 %v488_v30, %v408_v29  ;;  %v394_v34 = vld [vmem:[#allocation6 + $0x18] sm:$0xf0]  ;;  %v400_v35 = vld [vmem:[#allocation6 + $0x20] sm:$0xf]  ;;  %v486_v36 = vld [vmem:[#allocation6 + $0x24] sm:$0xf0] }
  0x1d   :  { %196 = vmatpush.bf16.msra.mxu0 %v433_v15  ;;  %v397_v37 = vor.u32 %v483_v32, %v394_v34  ;;  %v481_v38 = vld [vmem:[#allocation6 + $0x4] sm:$0xf]  ;;  %v401_v39 = vor.u32 %v486_v36, %v400_v35  ;;  %v386_v40 = vld [vmem:[#allocation6 + $0x8] sm:$0xf0]  ;;  %v392_v41 = vld [vmem:[#allocation6 + $0x10] sm:$0xf] }
  0x1e   :  { %v484_v42 = vld [vmem:[#allocation6 + $0x14] sm:$0xf0]  ;;  %v389_v43 = vor.u32 %v481_v38, %v386_v40  ;;  %v384_v45 = vld [vmem:[#allocation6] sm:$0xf]  ;;  %v482_v46 = vld [vmem:[#allocation6 + $0x4] sm:$0xf0] }
  0x1f   :  { %211 = vmatpush.bf16.msra.mxu1 %v429_v13  ;;  %v393_v44 = vor.u32 %v484_v42, %v392_v41  ;;  %v480_v47 = vld [vmem:[#allocation3] sm:$0xff]  ;;  %v385_v48 = vor.u32 %v482_v46, %v384_v45  ;;  %v502_v51 = vld [vmem:[#allocation9 + $0x28] sm:$0xff]  ;;  %v501_v52 = vld [vmem:[#allocation9 + $0x20] sm:$0xff]  ;;  %s658_s2 = smov [#allocation11]   ;;  %s363_s13 = sshll.u32 %s709_s4, 4  ;;  %s364_s13 = int_to_ptr.hbm [resolvable:$true] %s363_s13 }
  0x20   :  { %v504_v49 = vld [vmem:[#allocation9 + $0x38] sm:$0xff]  ;;  %v503_v50 = vld [vmem:[#allocation9 + $0x30] sm:$0xff]  ;;  %v498_v60 = vld [vmem:[#allocation9 + $0x8] sm:$0xff]  ;;  %s361_s3 = sshll.u32 %s658_s2, 4  ;;  %s362_s3 = int_to_ptr.vmem [resolvable:$true] %s361_s3 }
  0x21   :  { %197 = vmatpush.bf16.msra.mxu0 %v425_v21  ;;  %332 = vmatpush.bf16.msra.mxu2 %v504_v49  ;;  %v103_v53 = vld [vmem:[#allocation8] sm:$0x3]  ;;  %v499_v57 = vld [vmem:[#allocation9 + $0x10] sm:$0xff]  ;;  %v497_v62 = vld [vmem:[#allocation9] sm:$0xff] }
  0x22   :  { %v500_v54 = vld [vmem:[#allocation9 + $0x18] sm:$0xff]  ;;  %v106_v55 = vperm.slane %v103_v53, 1 }
  0x23   :  { %212 = vmatpush.bf16.msra.mxu1 %v421_v19  ;;  %v105_v19 = vperm.slane %v103_v53, 0 }
  0x25   :  { %198 = vmatpush.bf16.msra.mxu0 %v417_v27  ;;  %333 = vmatpush.bf16.msra.mxu2 %v503_v50 }
  0x27   :  { %213 = vmatpush.bf16.msra.mxu1 %v413_v25 }
  0x29   :  { %199 = vmatpush.bf16.msra.mxu0 %v409_v33  ;;  %334 = vmatpush.bf16.msra.mxu2 %v502_v51 }
  0x2b   :  { %214 = vmatpush.bf16.msra.mxu1 %v405_v31 }
  0x2d   :  { %200 = vmatpush.bf16.msra.mxu0 %v401_v39  ;;  %335 = vmatpush.bf16.msra.mxu2 %v501_v52 }
  0x2f   :  { %215 = vmatpush.bf16.msra.mxu1 %v397_v37 }
  0x31   :  { %201 = vmatpush.bf16.msra.mxu0 %v393_v44  ;;  %336 = vmatpush.bf16.msra.mxu2 %v500_v54 }
  0x33   :  { %216 = vmatpush.bf16.msra.mxu1 %v389_v43 }
  0x35   :  { %202 = vmatpush.bf16.msra.mxu0 %v385_v48  ;;  %337 = vmatpush.bf16.msra.mxu2 %v499_v57 }
  0x36   :  { %217 = vmatmul.bf16.vlgmr.msra.gmra.mxu1 %v480_v47 }
  0x38   :  { %203 = vmatmul.bf16.vlgmr.msra.gmra.mxu0 %v480_v47 }
  0x39   :  { %338 = vmatpush.bf16.msra.mxu2 %v498_v60 }
  0x3d   :  { %339 = vmatpush.bf16.msra.mxu2 %v497_v62 }
  0xb3   :  { %v218_v56 = vpop.f32.mrf.mxu1 }
  0xb4   :  { %v219_v58 = vadd.f32 %v218_v56, %v106_v55 }
  0xb5   :  { %v204_v9 = vpop.f32.mrf.mxu0 }
  0xb6   :  { %v446_v59 = vmul.f32 -1.442695, %v219_v58  ;;  %v205_v28 = vadd.f32 %v204_v9, %v105_v19 }
  0xb8   :  { %514 = vpow2.f32 %v446_v59 }
  0xbb   :  { %v220_v61 = vpop.f32.mrf.mxu1 }
  0xbc   :  { %v221_v63 = vadd.f32 %v220_v61, %v106_v55 }
  0xbd   :  { %v206_v25 = vpop.f32.mrf.mxu0 }
  0xbe   :  { %v515_v0 = vpop.eup %514  ;;  %v447_v1 = vmul.f32 -1.442695, %v221_v63  ;;  %v207_v31 = vadd.f32 %v206_v25, %v105_v19 }
  0xbf   :  { %v229_v2 = vadd.f32 1.0, %v515_v0 }
  0xc0   :  { %516 = vpow2.f32 %v447_v1 }
  0xc1   :  { %518 = vrcp.f32 %v229_v2  ;;  %v242_v12 = vand.u32 2147483648, %v229_v2  ;;  %vm236_vm1 = vweird.f32 %v229_v2  ;;  %v240_v13 = vand.u32 2147483647, %v229_v2 }
  0xc3   :  { %v243_v17 = vor.u32 1.1754944e-38, %v242_v12  ;;  %vm241_vm3 = vcmp.eq.f32.partialorder %v240_v13, 8.507059e+37 }
  0xc6   :  { %v517_v3 = vpop.eup %516 }
  0xc7   :  { %v519_v4 = vpop.eup %518  ;;  %v230_v5 = vadd.f32 1.0, %v517_v3 }
  0xc8   :  { %v232_v6 = vmul.f32 %v519_v4, %v229_v2  ;;  %vm237_vm0 = vweird.f32 %v519_v4 }
  0xc9   :  { %520 = vrcp.f32 %v230_v5  ;;  %vm238_vm2 = vmor %vm236_vm1, %vm237_vm0  ;;  %v257_v18 = vand.u32 2147483648, %v230_v5  ;;  %v255_v21 = vand.u32 2147483647, %v230_v5  ;;  %vm251_vm5 = vweird.f32 %v230_v5 }
  0xca   :  { %v233_v7 = vsub.f32 1.0, %v232_v6 }
  0xcb   :  { %v258_v24 = vor.u32 1.1754944e-38, %v257_v18  ;;  %vm256_vm7 = vcmp.eq.f32.partialorder %v255_v21, 8.507059e+37 }
  0xcc   :  { %v234_v8 = vmul.f32 %v519_v4, %v233_v7 }
  0xce   :  { %v235_v10 = vadd.f32 %v519_v4, %v234_v8 }
  0xcf   :  { %v521_v11 = vpop.eup %520 }
  0xd0   :  { %v247_v14 = vmul.f32 %v521_v11, %v230_v5  ;;  %v239_v15 = vsel %vm238_vm2, %v519_v4, %v235_v10  ;;  %vm252_vm4 = vweird.f32 %v521_v11 }
  0xd1   :  { %v244_v22 = vsel %vm241_vm3, %v243_v17, %v239_v15  ;;  %vm253_vm6 = vmor %vm251_vm5, %vm252_vm4 }
  0xd2   :  { %v248_v16 = vsub.f32 1.0, %v247_v14  ;;  %v261_v26 = vmul.f32 %v244_v22, %v219_v58 }
  0xd4   :  { %v249_v20 = vmul.f32 %v521_v11, %v248_v16  ;;  %v263_v32 = vmul.f32 %v261_v26, %v205_v28 }
  0xd6   :  { %v250_v23 = vadd.f32 %v521_v11, %v249_v20 }
  0xd8   :  { %v254_v27 = vsel %vm253_vm6, %v521_v11, %v250_v23 }
  0xd9   :  { %v259_v29 = vsel %vm256_vm7, %v258_v24, %v254_v27 }
  0xda   :  { %v262_v30 = vmul.f32 %v259_v29, %v221_v63 }
  0xdc   :  { %v264_v33 = vmul.f32 %v262_v30, %v207_v31 }
  0xde   :  { %v267_v34 = vpack.c.bf16 %v264_v33, %v263_v32 }
  0xe0   :  { %340 = vmatmul.bf16.vlgmr.msra.gmra.mxu2 %v267_v34 }
 0x163   :  { %v341_v35 = vpop.f32.mrf.mxu2 }
 0x164   :  { %355 = vst [vmem:[#allocation11] sm:$0xff] %v341_v35 }
 0x16b   :  { %v343_v36 = vpop.f32.mrf.mxu2 }
 0x16c   :  { %356 = vst [vmem:[#allocation11 + $0x8] sm:$0xff] %v343_v36 }
 0x16d   :  { %369 = dma.vmem_to_hbm [thread:$0]  %s362_s3, 256, %s364_s13, [#allocation5], %s651_s23, %s651_s23, %s652_s24  }
 0x16e   :  { %648 = dma.done.wait [#allocation5], 256  }
 0x16f   :  { %649 = vsyncadd [#allocation5], 4294967040 }
 0x170   :  { %374 = vsyncpa [#allocation4], 1 }
 0x171   :  { %375 = vsyncpa [#allocation7], 1 }
 0x172   :  { %376 = vsyncpa [#allocation10], 1 }
 0x173   :  { %377 = vsyncpa [#allocation5], 1 }

</bundles_post_ra>
